<compile_context>
chip_gen: v7x
topology: tpu7x:2x2x1
jax: 0.10.0
libtpu: 0.0.40
codegen_flags: <defaults>
</compile_context>

<pallas_src>
import numpy as np
import jax
import jax.numpy as jnp
from jax.experimental import pallas as pl
from jax.experimental.pallas import tpu as pltpu


# ----------------------------- Pallas kernels -----------------------------

def _gridmask_kernel(x_ref, mask_ref, o_ref):
    # x_ref: (B, HWT) block; mask_ref: (1, HWT) row-invariant block -> broadcast.
    o_ref[...] = x_ref[...] * mask_ref[...]


def _gridmask_offset_kernel(x_ref, mask_ref, off_ref, o_ref):
    # Mask is exactly 0/1 (binary strips; NN rotation preserves that), so
    # x*m + off*(1-m) is a pure select: one VALU op per vreg and bit-exact.
    o_ref[...] = jnp.where(mask_ref[...] != 0, x_ref[...], off_ref[...])


# --------------------------- block-size selection --------------------------

def _round_up(v, m):
    return ((v + m - 1) // m) * m


def _vmem_limit_bytes():
    """Generation-aware scoped-VMEM limit (3/4 of physical, capped at 96 MiB)."""
    try:
        cap = int(pltpu.get_tpu_info().vmem_capacity_bytes)
    except Exception:
        cap = 64 * 1024 * 1024            # conservative: v7x-class 64 MiB VMEM
    return max(32 * 1024 * 1024, min((cap * 3) // 4, 96 * 1024 * 1024))


def _choose_blocks(nc, hw, itemsize, vmem_limit):
    """Pick (row_block, hw_block) for the flattened (NC, H*W) view.

    Blocks are sized so triple-buffered x + out stay inside vmem_limit while
    each grid step still moves MiB-scale data (per-step overhead ~0.35 us).
    """
    target_bytes = max(vmem_limit // 8, 1 << 20)
    align = max(8, 32 // itemsize)        # sublane packing: 8 f32 / 16 bf16 / 32 i8
    row_bytes = hw * itemsize

    if align * row_bytes <= target_bytes:
        hw_tile = hw                      # full lane extent -> wide unmasked vst
        b = (target_bytes // row_bytes) // align * align
        b = max(align, min(b, _round_up(nc, align)))
    else:
        # Full rows do not fit: tile H*W into lane-dense multiples of 128.
        hw_tile = max(128, (target_bytes // (align * itemsize)) // 128 * 128)
        b = align

    # v7x megacore: aim for an even (>=2) number of parallel grid steps.
    row_steps = pl.cdiv(nc, b)
    hw_steps = pl.cdiv(hw, hw_tile)
    if row_steps * hw_steps < 2:
        if nc > align:
            b = _round_up(pl.cdiv(nc, 2), align)
        elif hw_tile == hw and hw >= 256:
            hw_tile = _round_up(pl.cdiv(hw, 2), 128)
        row_steps = pl.cdiv(nc, b)
        hw_steps = pl.cdiv(hw, hw_tile)
    if (row_steps * hw_steps) % 2 == 1 and row_steps > 1:
        b_try = _round_up(pl.cdiv(nc, row_steps + 1), align)
        if b_try >= align and (pl.cdiv(nc, b_try) * hw_steps) % 2 == 0:
            b = b_try
    return b, hw_tile


def _maybe_buffered(block_shape, index_map, buffers):
    """BlockSpec with deeper pipelining when supported; plain spec otherwise."""
    if buffers > 2 and hasattr(pl, "Buffered"):
        try:
            return pl.BlockSpec(block_shape, index_map,
                                pipeline_mode=pl.Buffered(buffers))
        except TypeError:
            pass
    return pl.BlockSpec(block_shape, index_map)


def gridmask_apply(x_flat, mask, offset=None):
    """x_flat: (NC, H, W); mask: (H, W); offset: (H, W) or None.

    Data is presented lane-dense as (NC, H*W) and tiled over a 2-axis ragged
    grid (row blocks x lane-dense H*W blocks); the mask/offset are
    (1, hw_tile) blocks, invariant across the row axis, broadcast in-kernel.
    Works for any dtype (bf16 inputs halve HBM traffic on this BW-bound op).
    """
    nc, h, w = x_flat.shape
    hw = h * w
    dtype = x_flat.dtype
    itemsize = jnp.dtype(dtype).itemsize

    x2 = x_flat.reshape(nc, hw)
    mask2 = mask.reshape(1, hw).astype(dtype)
    off2 = None if offset is None else offset.reshape(1, hw).astype(dtype)

    vmem_limit = _vmem_limit_bytes()
    b, hw_tile = _choose_blocks(nc, hw, itemsize, vmem_limit)

    row_steps = pl.cdiv(nc, b)
    hw_steps = pl.cdiv(hw, hw_tile)
    grid = (row_steps, hw_steps)          # ragged last blocks handled by Pallas

    # 3-deep buffering only when the grid is long enough to benefit and
    # 3x (x + out) blocks (+ mask/offset) stay well under the VMEM limit.
    block_bytes = b * hw_tile * itemsize
    mask_bytes = hw_tile * itemsize * (2 if off2 is not None else 1)
    buffers = 3 if (row_steps * hw_steps >= 3 and
                    6 * block_bytes + 3 * mask_bytes <= (vmem_limit * 3) // 4) else 2

    x_spec = _maybe_buffered((b, hw_tile), lambda i, j: (i, j), buffers)
    out_spec = _maybe_buffered((b, hw_tile), lambda i, j: (i, j), buffers)
    hw_spec = pl.BlockSpec((1, hw_tile), lambda i, j: (0, j))   # row-invariant

    cp = pltpu.CompilerParams(
        dimension_semantics=("parallel", "parallel"),
        vmem_limit_bytes=vmem_limit,
    )
    out_shape = jax.ShapeDtypeStruct((nc, hw), dtype)

    if off2 is None:
        y2 = pl.pallas_call(
            _gridmask_kernel,
            out_shape=out_shape,
            grid=grid,
            in_specs=[x_spec, hw_spec],
            out_specs=out_spec,
            compiler_params=cp,
        )(x2, mask2)
    else:
        y2 = pl.pallas_call(
            _gridmask_offset_kernel,
            out_shape=out_shape,
            grid=grid,
            in_specs=[x_spec, hw_spec, hw_spec],
            out_specs=out_spec,
            compiler_params=cp,
        )(x2, mask2, off2)

    return y2.reshape(nc, h, w)


# ------------------------- GridMask module (JAX) --------------------------

class GridMask:
    def __init__(self, use_h, use_w, rotate=1, offset=False, ratio=0.5,
                 mode=0, prob=1.0, seed=0):
        self.use_h = use_h
        self.use_w = use_w
        self.rotate = rotate
        self.offset = offset
        self.ratio = ratio
        self.mode = mode
        self.st_prob = prob
        self.prob = prob
        self.training = True
        self._rng = np.random.RandomState(seed)  # deterministic "randomness"
        self._prepared = {}   # (h, w, dtype) -> (mask_np, mask_dev, off_np, off_dev)
        self._last_mask = None
        self._last_offset = None

    def set_prob(self, epoch, max_epoch):
        self.prob = self.st_prob * epoch / max_epoch

    @staticmethod
    def _rotate_nearest(mask, angle_deg):
        # TODO(synk): nearest-neighbour stand-in for PIL Image.rotate(); the
        # sub-pixel center convention may differ from PIL by <= 1 pixel.
        if angle_deg % 360 == 0:
            return mask
        hh, ww = mask.shape
        a = np.deg2rad(angle_deg)
        cy, cx = (hh - 1) * 0.5, (ww - 1) * 0.5
        yy, xx = np.meshgrid(np.arange(hh, dtype=np.float64),
                             np.arange(ww, dtype=np.float64), indexing="ij")
        cos_a, sin_a = np.cos(a), np.sin(a)
        src_x = cos_a * (xx - cx) + sin_a * (yy - cy) + cx
        src_y = -sin_a * (xx - cx) + cos_a * (yy - cy) + cy
        sx = np.rint(src_x).astype(np.int64)
        sy = np.rint(src_y).astype(np.int64)
        valid = (sx >= 0) & (sx < ww) & (sy >= 0) & (sy < hh)
        out = np.zeros_like(mask)
        out[valid] = mask[sy[valid], sx[valid]]
        return out

    def _build_mask(self, h, w):
        hh = int(1.5 * h)
        ww = int(1.5 * w)
        d = int(self._rng.randint(2, h))
        self.l = min(max(int(d * self.ratio + 0.5), 1), d - 1)
        mask = np.ones((hh, ww), np.float32)
        st_h = int(self._rng.randint(d))
        st_w = int(self._rng.randint(d))
        if self.use_h:
            for i in range(hh // d):
                s = d * i + st_h
                t = min(s + self.l, hh)
                mask[s:t, :] *= 0
        if self.use_w:
            for i in range(ww // d):
                s = d * i + st_w
                t = min(s + self.l, ww)
                mask[:, s:t] *= 0
        r = int(self._rng.randint(self.rotate))
        mask = self._rotate_nearest(mask, r)
        mask = np.float32(np.uint8(mask))   # mimic the uint8 round-trip
        mask = mask[(hh - h) // 2:(hh - h) // 2 + h,
                    (ww - w) // 2:(ww - w) // 2 + w]
        if self.mode == 1:
            mask = 1.0 - mask
        return mask

    def _prepare(self, h, w, dtype):
        """Build the next random mask (+offset) and start its async H2D copy."""
        mask_np = self._build_mask(h, w)
        mask_dev = jnp.asarray(mask_np, dtype=dtype)        # async transfer
        off_np = off_dev = None
        if self.offset:
            off_np = (2.0 * (self._rng.rand(h, w) - 0.5)).astype(np.float32)
            off_dev = jnp.asarray(off_np, dtype=dtype)
        self._prepared[(h, w, jnp.dtype(dtype).name)] = (
            mask_np, mask_dev, off_np, off_dev)

    def __call__(self, x):
        # x: jnp array (n, c, h, w)
        if self._rng.rand() > self.prob or not self.training:
            return x
        n, c, h, w = x.shape
        key = (h, w, jnp.dtype(x.dtype).name)
        if key not in self._prepared:       # cold start: build synchronously
            self._prepare(h, w, x.dtype)
        mask_np, mask_dev, off_np, off_dev = self._prepared.pop(key)
        self._last_mask, self._last_offset = mask_np, off_np

        x_flat = x.reshape(-1, h, w)
        if self.offset:
            y = gridmask_apply(x_flat, mask_dev, off_dev)
        else:
            y = gridmask_apply(x_flat, mask_dev)

        # Prebuild the next mask now (after dispatch) so host-side numpy work
        # and H2D transfer overlap device execution of this training step.
        self._prepare(h, w, x.dtype)
        return y.reshape(n, c, h, w)


# --------------------------------- main ------------------------------------

if __name__ == "__main__":
    key = jax.random.PRNGKey(0)
    n, c, h, w = 2, 4, 16, 16
    x = jax.random.normal(key, (n, c, h, w), dtype=jnp.float32)

    # Path 1: plain mask multiply.
    gm = GridMask(use_h=True, use_w=True, rotate=1, offset=False,
                  ratio=0.5, mode=0, prob=1.0, seed=0)
    gm.training = True
    y = jax.block_until_ready(gm(x))
    mask = jnp.asarray(gm._last_mask, dtype=x.dtype)
    y_ref = x * mask[None, None, :, :]
    np.testing.assert_allclose(np.asarray(y), np.asarray(y_ref), rtol=0, atol=0)

    # Path 2: offset blend (select form; exact because the mask is binary).
    gm2 = GridMask(use_h=True, use_w=True, rotate=1, offset=True,
                   ratio=0.5, mode=0, prob=1.0, seed=1)
    gm2.training = True
    y2 = jax.block_until_ready(gm2(x))
    mask2 = jnp.asarray(gm2._last_mask, dtype=x.dtype)
    off2 = jnp.asarray(gm2._last_offset, dtype=x.dtype)
    y2_ref = (x * mask2[None, None, :, :]
              + off2[None, None, :, :] * (1.0 - mask2[None, None, :, :]))
    np.testing.assert_allclose(np.asarray(y2), np.asarray(y2_ref), rtol=0, atol=0)

    print("KERNEL_OK")
</pallas_src>

<mosaic_0001>
module attributes {stable_mosaic.version = 11 : i64} {
  func.func @_gridmask_kernel(%arg0: i32, %arg1: i32, %arg2: memref<8x128xf32, #tpu.memory_space<vmem>>, %arg3: memref<1x128xf32, #tpu.memory_space<vmem>>, %arg4: memref<8x128xf32, #tpu.memory_space<vmem>>) attributes {dimension_semantics = [#tpu.dimension_semantics<parallel>, #tpu.dimension_semantics<parallel>], iteration_bounds = array<i64: 1, 2>, scalar_prefetch = 0 : i64, scratch_operands = 0 : i64, tpu.core_type = #tpu.core_type<tc>, window_params = [{transform_indices = @transform_0, window_bounds = array<i64: 8, 128>}, {transform_indices = @transform_1, window_bounds = array<i64: 1, 128>}, {transform_indices = @transform_2, window_bounds = array<i64: 8, 128>}]} {
    %c0 = arith.constant 0 : index
    %c0_0 = arith.constant 0 : index
    %0 = vector.load %arg2[%c0, %c0_0] : memref<8x128xf32, #tpu.memory_space<vmem>>, vector<8x128xf32>
    %c0_1 = arith.constant 0 : index
    %c0_2 = arith.constant 0 : index
    %1 = vector.load %arg3[%c0_1, %c0_2] : memref<1x128xf32, #tpu.memory_space<vmem>>, vector<1x128xf32>
    %2 = vector.broadcast %1 : vector<1x128xf32> to vector<8x128xf32>
    %3 = arith.mulf %0, %2 : vector<8x128xf32>
    %c0_3 = arith.constant 0 : index
    %c0_4 = arith.constant 0 : index
    %4 = vector.load %arg4[%c0_3, %c0_4] : memref<8x128xf32, #tpu.memory_space<vmem>>, vector<8x128xf32>
    tpu.vector_store %arg4[%c0_3, %c0_4], %3 {strides = array<i32>} : memref<8x128xf32, #tpu.memory_space<vmem>>, vector<8x128xf32>,
    return
  }
  func.func @transform_0(%arg0: i32, %arg1: i32) -> (i32, i32) {
    %c0_i32 = arith.constant 0 : i32
    return %arg0, %arg1 : i32, i32
  }
  func.func @transform_1(%arg0: i32, %arg1: i32) -> (i32, i32) {
    %c0_i32 = arith.constant 0 : i32
    %c0_i32_0 = arith.constant 0 : i32
    return %c0_i32, %arg1 : i32, i32
  }
  func.func @transform_2(%arg0: i32, %arg1: i32) -> (i32, i32) {
    %c0_i32 = arith.constant 0 : i32
    return %arg0, %arg1 : i32, i32
  }
}

</mosaic_0001>

<bundles_post_ra>
// kernel: tpu_custom_call.1
= control target key start
LH: loop header
LB: loop body
LE: loop exit
PB: predicated region body
PF: predicated region fallthrough
CT: control target
= control target key end

     0   :  { %7 = vsyncpa [#allocation3], 0  ;;  %s692_s0 = inlined_call_operand.hbm [shape: f32[8,256], index: 0, kind: input, shape index: {}]   ;;  %s693_s1 = inlined_call_operand.vmem [shape: f32[1,256], index: 1, kind: input, shape index: {}]   ;;  %s694_s2 = inlined_call_operand.hbm [shape: f32[8,256], index: 2, kind: output, shape index: {}]  }
   0x1   :  { %9 = vsyncpa [#allocation3 + $0x1], 0 }
   0x2   :  { %10 = vsyncpa [#allocation4], 0 }
   0x3   :  { %12 = vsyncpa [#allocation4 + $0x1], 0  ;;  %s515_s9 = smov 0   ;;  %s517_s10 = smov 0  }
   0x4   :  { %s519_s11 = smov 0   ;;  %s521_s12 = smov 0  }
   0x5   :  { %s523_s13 = smov 0   ;;  %s525_s14 = smov 0  }
   0x6 LB: > { %s308_s15 = sadd.s32 4294967295, %s496_s14   ;;  %s309_s16 = sadd.s32 4294967294, %s496_s14   ;;  %s496_s14 = sphi %s525_s14, %s18_s14   ;;  %s492_s13 = sphi %s523_s13, %s710_s13   ;;  %s488_s12 = sphi %s521_s12, %s709_s12   ;;  %s484_s11 = sphi %s519_s11, %s708_s11   ;;  %s480_s10 = sphi %s517_s10, %s707_s10   ;;  %s476_s9 = sphi %s515_s9, %s706_s9  }
   0x7   : > { %s27_s17 = sadd.s32 1, %s492_s13  ;;  %s39_s18 = sadd.s32 1, %s484_s11 }
   0x8   : > { %p28_p0 = scmp.ge.s32.totalorder %s27_s17, 2  ;;  %p46_p1 = scmp.ne.s32.totalorder %s484_s11, %s480_s10 }
   0x9   : > { %p47_p2 = scmp.eq.s32.totalorder %s496_s14, 0  ;;  %p52_p3 = scmp.ne.s32.totalorder %s480_s10, %s476_s9 }
   0xa   : > { %s712_s17 = smov (%p28_p0, %s27_s17), 0  ;;  %p53_p5 = scmp.eq.s32.totalorder %s308_s15, 0 }
   0xb   : > { %p556_p4 = por %p47_p2, %p46_p1  ;;  %s35_s20 = ssub.s32 %s492_s13, %s712_s17 }
   0xc   : > { %p104_p6 = scmp.eq.s32.totalorder %s308_s15, 1  ;;  %p37_p7 = scmp.eq.s32.totalorder %s35_s20, 0 }
   0xd   : > { %p562_p8 = por %p53_p5, %p52_p3  ;;  %p110_p10 = scmp.eq.s32.totalorder %s309_s16, 1 }
   0xe   : > { %p566_p9 = por %p104_p6, %p46_p1  ;;  %p334_p13 = scmp.lt.s32.totalorder %s496_s14, 2 }
   0xf   : > { %s571_s23 = scalar_select %p37_p7, %s484_s11, %s39_s18  }
  0x10   : > { %s698_s22 = scalar_select %p566_p9, 1, 0 }
  0x11   : > { %p573_p11 = por %p110_p10, %p52_p3  ;;  %s130_s25 = sand.u32 1, %s484_s11  }
  0x12   : > { %s312_s26 = sshll.u32 %s130_s25, 3  ;;  %s313_s27 = sshll.u32 %s492_s13, 7 }
  0x13   : > { %s699_s24 = scalar_select %p573_p11, 1, 0 }
  0x14   : > { %s584_s30 = scalar_lea.hbm %s692_s0, %s313_s27  ;;  %s134_s3 = scalar_lea.vmem [#allocation2], %s312_s26 }
  0x15   : > { %s143_s4 = sshll.u32 %s134_s3, 4  ;;  %p590_p0 = pnand %p334_p13, %p556_p4  ;;  %s586_s4 = int_to_ptr.vmem [resolvable:$true] %s143_s4 }
  0x16   : > { %s131_s6 = scalar_lea.sflag [#allocation3], %s130_s25  ;;  %s384_s7 = scalar_lea.hbm %s584_s30, 128 }
  0x17   : > { %p385_p3 = scmp.ne.s32.totalorder %s584_s30, %s384_s7  ;;  %p386_p5 = pneg %p590_p0 }
  0x18   : > { %s389_s16 = scalar_lea.hbm %s692_s0, 256  ;;  %p390_p4 = scmp.lt.u32.totalorder %s584_s30, %s692_s0 }
  0x19   : > { %p387_p6 = pnand %p386_p5, %p385_p3  ;;  %p391_p10 = scmp.lt.u32.totalorder %s389_s16, %s384_s7 }
  0x1a   : > { %p393_p12 = scmp.lt.u32.totalorder %s384_s7, %s584_s30 }
  0x1b   : > { %p388_p7 = pneg %p387_p6  ;;  %p392_p13 = por %p391_p10, %p390_p4 }
  0x1d   : > { %p394_p1 = por %p393_p12, %p392_p13 }
  0x1f   : > { %p395_p2 = pnand %p394_p1, %p388_p7 }
  0x21   : > { %398 = shalt.err (!%p395_p2)
}
  0x22   : > { %s399_s20 = scalar_lea.vmem %s586_s4, 128  ;;  %s498_s25 = smov [#allocation2]  }
  0x23   : > { %p400_p3 = scmp.ne.s32.totalorder %s586_s4, %s399_s20  ;;  %s404_s26 = sshll.u32 %s498_s25, 4  ;;  %s405_s26 = int_to_ptr.vmem [resolvable:$false] %s404_s26 }
  0x24   : > { %s406_s27 = scalar_lea.vmem %s405_s26, 256  ;;  %p407_p9 = scmp.lt.s32.totalorder %s586_s4, %s405_s26 }
  0x25   : > { %p402_p6 = pnand %p400_p3, %p386_p5  ;;  %p408_p4 = scmp.lt.s32.totalorder %s406_s27, %s399_s20 }
  0x27   : > { %p403_p11 = pneg %p402_p6  ;;  %p409_p10 = por %p408_p4, %p407_p9 }
  0x29   : > { %p410_p12 = pnand %p409_p10, %p403_p11 }
  0x2b   : > { %413 = shalt.err (!%p410_p12)
}
  0x2c   : > { %329 = dma.hbm_to_vmem [thread:$0]  (!%p590_p0), %s584_s30, 128, %s586_s4, %s131_s6  }
  0x2d   : > { %p701_p1 = scmp.lt.s32.totalorder %s496_s14, 3  ;;  %p702_p2 = scmp.ge.s32.totalorder %s496_s14, 1 }
  0x2f   : > { %p155_p5 = pnand %p702_p2, %p701_p1 }
  0x30   : > { %s626_s28 = sand.u32 (!%p155_p5), 1, %s480_s10  }
  0x31   : > { %158 = sbr.rel (%p155_p5) target bundleno = 85 (0x55), region = 28  ;;  %s315_s29 = sshll.u32 (!%p155_p5), %s626_s28, 3 }
  0x32   : > { %s161_s3 = scalar_lea.sflag (!%p155_p5), [#allocation3], %s626_s28  ;;  %s164_s7 = scalar_lea.vmem (!%p155_p5), [#allocation2], %s315_s29 }
  0x38   : > { %467 = dma.done.wait (%p562_p8), %s161_s3, 128  }
  0x39   : > { %469 = vsyncadd (%p562_p8), %s161_s3, 4294967168  ;;  %p188_p9 = scmp.lt.s32.totalorder %s488_s12, 1  ;;  %s187_s8 = scalar_lea.vmem [#allocation5], %s315_s29  ;;  %v191_v0 = vld [vmem:[%s164_s7] sm:$0xff] }
  0x3a   : > { %s217_s15 = sshll.u32 %s187_s8, 4  ;;  %s319_s16 = sshll.u32 %s488_s12, 7  ;;  %s640_s15 = int_to_ptr.vmem [resolvable:$true] %s217_s15 }
  0x3b   : > { %s189_s30 = scalar_select %p188_p9, %s488_s12, 1 }
  0x3c   : > { %s645_s19 = scalar_lea.hbm %s694_s2, %s319_s16  ;;  %s202_s20 = scalar_lea.sflag [#allocation4], %s626_s28 }
  0x3d   : > { %s190_s6 = scalar_lea.vmem %s693_s1, %s189_s30  ;;  %s414_s25 = scalar_lea.vmem %s640_s15, 128 }
  0x3e   : > { %v317_v1 = vld [vmem:[%s190_s6] ss:$0 sm:$0xff]  ;;  %p415_p8 = scmp.ne.s32.totalorder %s640_s15, %s414_s25  ;;  %p703_p11 = scmp.ne.s32.totalorder %s698_s22, 0 }
  0x3f   : > { %v199_v2 = vmul.f32 %v317_v1, %v191_v0  ;;  %s499_s12 = smov [#allocation5]  }
  0x40   : > { %p416_p0 = pnand %p415_p8, %p703_p11  ;;  %s418_s26 = sshll.u32 %s499_s12, 4  ;;  %s419_s26 = int_to_ptr.vmem [resolvable:$false] %s418_s26 }
  0x41   : > { %200 = vst [vmem:[%s187_s8] sm:$0xff] %v199_v2  ;;  %s420_s27 = scalar_lea.vmem %s419_s26, 256  ;;  %p421_p13 = scmp.lt.s32.totalorder %s640_s15, %s419_s26 }
  0x42   : > { %p417_p7 = pneg %p416_p0  ;;  %p422_p3 = scmp.lt.s32.totalorder %s420_s27, %s414_s25 }
  0x44   : > { %p423_p6 = por %p422_p3, %p421_p13 }
  0x46   : > { %p424_p4 = pnand %p423_p6, %p417_p7 }
  0x48   : > { %427 = shalt.err (!%p424_p4)
}
  0x49   : > { %s428_s28 = scalar_lea.hbm %s645_s19, 128  ;;  %s432_s7 = scalar_lea.hbm %s694_s2, 256 }
  0x4a   : > { %p429_p10 = scmp.ne.s32.totalorder %s645_s19, %s428_s28  ;;  %p433_p2 = scmp.lt.u32.totalorder %s645_s19, %s694_s2 }
  0x4b   : > { %p434_p5 = scmp.lt.u32.totalorder %s432_s7, %s428_s28  ;;  %p436_p8 = scmp.lt.u32.totalorder %s428_s28, %s645_s19 }
  0x4c   : > { %p430_p12 = pnand %p429_p10, %p703_p11 }
  0x4d   : > { %p435_p9 = por %p434_p5, %p433_p2 }
  0x4e   : > { %p431_p1 = pneg %p430_p12 }
  0x4f   : > { %p437_p0 = por %p436_p8, %p435_p9 }
  0x51   : > { %p438_p7 = pnand %p437_p0, %p431_p1 }
  0x53   : > { %441 = shalt.err (!%p438_p7)
}
  0x54   : > { %324 = dma.vmem_to_hbm [thread:$0]  (%p703_p11), %s640_s15, 128, %s645_s19, %s202_s20  }
  0x55 PF: > { %s229_s5 = sand.u32 1, %s476_s9   ;;  %p704_p13 = scmp.ne.s32.totalorder %s699_s24, 0 }
  0x56   : > { %p705_p3 = scmp.ge.s32.totalorder %s496_s14, 2  ;;  %s230_s6 = scalar_lea.sflag [#allocation4], %s229_s5 }
  0x58   : > { %p331_p6 = pnand %p705_p3, %p704_p13 }
  0x5a   : > { %471 = dma.done.wait (!%p331_p6), %s230_s6, 128  }
  0x5b   : > { %473 = vsyncadd (!%p331_p6), %s230_s6, 4294967168  ;;  %s18_s14 = sadd.s32 1, %s496_s14   ;;  %s706_s9 = smov %s480_s10 }
  0x5c   : > { %p15_p4 = scmp.ge.s32.totalorder %s18_s14, 4   ;;  %s707_s10 = smov %s484_s11 }
  0x5d   : > { %s708_s11 = smov %s571_s23  ;;  %s709_s12 = smov %s492_s13 }
  0x5e   : > { %s710_s13 = smov %s712_s17  ;;  %17 = sbr.rel (!%p15_p4) target bundleno = 6 (0x6), region = 76 }
  0x65   :  { %235 = vsyncpa [#allocation3], 1 }
  0x66   :  { %237 = vsyncpa [#allocation3 + $0x1], 1 }
  0x67   :  { %238 = vsyncpa [#allocation4], 1 }
  0x68   :  { %240 = vsyncpa [#allocation4 + $0x1], 1 }

</bundles_post_ra>
